<compile_context>
chip_gen: v5e
topology: v5e:2x2
jax: 0.10.0
libtpu: 0.0.40
codegen_flags: <defaults>
</compile_context>

<pallas_src>
import functools

import jax
import jax.numpy as jnp
from jax.experimental import pallas as pl
from jax.experimental.pallas import tpu as pltpu  # noqa: F401


# ----------------------------------------------------------------------------
# Pallas kernels: hoisted input-gate projection (all timesteps, both directions)
# ----------------------------------------------------------------------------
def _gate_proj_kernel(x_ref, w_ref, b_ref, o_ref):
    # (M, Din) @ (Din, 8H) + (1, 8H)
    o_ref[...] = (jnp.dot(x_ref[...], w_ref[...],
                          preferred_element_type=jnp.float32)
                  + b_ref[...])


def _gate_proj2_kernel(xf_ref, xb_ref, wf_ref, wb_ref, b_ref, o_ref):
    # [Hf | Hb] @ [[Wf],[Wb]] == Hf @ Wf + Hb @ Wb  (avoids materializing the
    # concatenated (seq, B, 2H) layer input of layers > 0).
    o_ref[...] = (jnp.dot(xf_ref[...], wf_ref[...],
                          preferred_element_type=jnp.float32)
                  + jnp.dot(xb_ref[...], wb_ref[...],
                            preferred_element_type=jnp.float32)
                  + b_ref[...])


def gate_projection(x2d, w, b):
    """x2d: (seq*B, Din); w: (Din, 8H); b: (1, 8H) -> (seq*B, 8H)."""
    M, Din = x2d.shape
    G = w.shape[1]
    # TODO(synk): for long seq*B, tile the row dimension with a grid instead of
    # one full-array block.
    return pl.pallas_call(
        _gate_proj_kernel,
        out_shape=jax.ShapeDtypeStruct((M, G), jnp.float32),
        in_specs=[
            pl.BlockSpec((M, Din), lambda: (0, 0)),
            pl.BlockSpec((Din, G), lambda: (0, 0)),
            pl.BlockSpec((1, G), lambda: (0, 0)),
        ],
        out_specs=pl.BlockSpec((M, G), lambda: (0, 0)),
    )(x2d, w, b)


def gate_projection2(xf2d, xb2d, wf, wb, b):
    """xf2d/xb2d: (seq*B, H); wf/wb: (H, 8H); b: (1, 8H) -> (seq*B, 8H)."""
    M, H = xf2d.shape
    G = wf.shape[1]
    return pl.pallas_call(
        _gate_proj2_kernel,
        out_shape=jax.ShapeDtypeStruct((M, G), jnp.float32),
        in_specs=[
            pl.BlockSpec((M, H), lambda: (0, 0)),
            pl.BlockSpec((M, H), lambda: (0, 0)),
            pl.BlockSpec((H, G), lambda: (0, 0)),
            pl.BlockSpec((H, G), lambda: (0, 0)),
            pl.BlockSpec((1, G), lambda: (0, 0)),
        ],
        out_specs=pl.BlockSpec((M, G), lambda: (0, 0)),
    )(xf2d, xb2d, wf, wb, b)


# ----------------------------------------------------------------------------
# Pallas kernel: fused fwd+bwd recurrence for one layer, whole sequence in one
# kernel invocation (in-kernel fori_loop; no per-timestep grid overhead).
# ----------------------------------------------------------------------------
def _bilstm_rec_kernel(xg_ref, whh_f_ref, whh_b_ref,
                       hseq_f_ref, hseq_b_ref, hfin_f_ref, hfin_b_ref):
    seq, B, _ = xg_ref.shape
    H = whh_f_ref.shape[0]
    G = 4 * H

    def cell(gates, c_prev):
        # Gate order [i, f, g, o] (PyTorch).  NOTE: with H < 128 these slices
        # are sub-vreg; at production H (multiple of 128) they are lane-aligned.
        i_g = jax.nn.sigmoid(gates[:, 0 * H:1 * H])
        f_g = jax.nn.sigmoid(gates[:, 1 * H:2 * H])
        g_g = jnp.tanh(gates[:, 2 * H:3 * H])
        o_g = jax.nn.sigmoid(gates[:, 3 * H:4 * H])
        c = f_g * c_prev + i_g * g_g
        h = o_g * jnp.tanh(c)
        return h, c

    def step(t, carry):
        h_f, c_f, h_b, c_b = carry
        rt = seq - 1 - t
        xg_t = xg_ref[t]          # (B, 8H): [fwd gates @ t | bwd gates @ t]
        xg_rt = xg_ref[rt]        # bwd direction consumes original time rt
        g_f = xg_t[:, 0:G] + jnp.dot(h_f, whh_f_ref[...],
                                     preferred_element_type=jnp.float32)
        g_b = xg_rt[:, G:2 * G] + jnp.dot(h_b, whh_b_ref[...],
                                          preferred_element_type=jnp.float32)
        h_f, c_f = cell(g_f, c_f)
        h_b, c_b = cell(g_b, c_b)
        hseq_f_ref[t] = h_f
        hseq_b_ref[rt] = h_b      # stored back in forward time order
        return h_f, c_f, h_b, c_b

    z = jnp.zeros((B, H), jnp.float32)
    h_f, _, h_b, _ = jax.lax.fori_loop(0, seq, step, (z, z, z, z))
    # Final states written exactly once; c_final is never needed downstream.
    hfin_f_ref[...] = h_f
    hfin_b_ref[...] = h_b


def bilstm_layer_recurrence(xg, w_hh_f, w_hh_b):
    """xg: (seq, B, 8H) precomputed input gates (+bias) for both directions.
    Returns h_seq_f (seq,B,H), h_seq_b (seq,B,H, forward time order),
    h_fin_f (B,H), h_fin_b (B,H)."""
    seq, B, G8 = xg.shape
    H = w_hh_f.shape[0]
    # TODO(synk): for long sequences, grid over time chunks instead of keeping
    # the whole (seq, B, 8H) gate tensor resident in VMEM.
    return pl.pallas_call(
        _bilstm_rec_kernel,
        out_shape=(
            jax.ShapeDtypeStruct((seq, B, H), jnp.float32),
            jax.ShapeDtypeStruct((seq, B, H), jnp.float32),
            jax.ShapeDtypeStruct((B, H), jnp.float32),
            jax.ShapeDtypeStruct((B, H), jnp.float32),
        ),
        in_specs=[
            pl.BlockSpec((seq, B, G8), lambda: (0, 0, 0)),
            pl.BlockSpec((H, 4 * H), lambda: (0, 0)),
            pl.BlockSpec((H, 4 * H), lambda: (0, 0)),
        ],
        out_specs=[
            pl.BlockSpec((seq, B, H), lambda: (0, 0, 0)),
            pl.BlockSpec((seq, B, H), lambda: (0, 0, 0)),
            pl.BlockSpec((B, H), lambda: (0, 0)),
            pl.BlockSpec((B, H), lambda: (0, 0)),
        ],
    )(xg, w_hh_f, w_hh_b)


# ----------------------------------------------------------------------------
# Full BiLSTM forward
# ----------------------------------------------------------------------------
def bilstm_forward(text, kparams):
    """text: (seq, B) int32. kparams: prepared params. Returns (B, out_dim)."""
    emb = jnp.take(kparams["embedding"], text, axis=0)      # (seq, B, E) glue gather
    seq, B, _ = emb.shape
    B_pad = ((B + 7) // 8) * 8                               # full sublanes
    if B_pad != B:
        emb = jnp.pad(emb, ((0, 0), (0, B_pad - B), (0, 0)))

    x_f, x_b = emb, None
    h_fin_f = h_fin_b = None
    for li, lp in enumerate(kparams["lstm"]):
        H = lp["w_hh_f"].shape[0]
        if li == 0:
            xg = gate_projection(x_f.reshape(seq * B_pad, -1),
                                 lp["w_in"], lp["b_in"])
        else:
            xg = gate_projection2(x_f.reshape(seq * B_pad, H),
                                  x_b.reshape(seq * B_pad, H),
                                  lp["w_in_f"], lp["w_in_b"], lp["b_in"])
        xg = xg.reshape(seq, B_pad, 8 * H)
        x_f, x_b, h_fin_f, h_fin_b = bilstm_layer_recurrence(
            xg, lp["w_hh_f"], lp["w_hh_b"])
        # TODO(synk): nn.LSTM inter-layer dropout is a no-op in eval mode.

    hidden = jnp.concatenate([h_fin_f[:B], h_fin_b[:B]], axis=-1)    # (B, 2H)
    # nn.Dropout in eval mode == identity.  Final fc in plain XLA per review:
    # (B, 2H) @ (2H, out_dim=4) is smaller than a pallas_call launch.
    return hidden @ kparams["fc_w"] + kparams["fc_b"][0]


# ----------------------------------------------------------------------------
# Parameter init (canonical layout) + kernel-friendly preparation
# ----------------------------------------------------------------------------
def init_params(key, vocab_size, embedding_dim, hidden_dim, output_dim,
                n_layers, pad_idx):
    keys = jax.random.split(key, 4 + 6 * n_layers)
    k_iter = iter(keys)

    emb = jax.random.normal(next(k_iter), (vocab_size, embedding_dim),
                            jnp.float32)
    emb = emb.at[pad_idx].set(0.0)  # padding_idx row is zero

    kscale = 1.0 / jnp.sqrt(jnp.float32(hidden_dim))

    def uni(k, shape):
        return jax.random.uniform(k, shape, jnp.float32, -kscale, kscale)

    lstm_params = []
    for layer in range(n_layers):
        in_dim = embedding_dim if layer == 0 else 2 * hidden_dim
        lstm_params.append({
            "w_ih_f": uni(next(k_iter), (in_dim, 4 * hidden_dim)),
            "w_hh_f": uni(next(k_iter), (hidden_dim, 4 * hidden_dim)),
            "b_f":    uni(next(k_iter), (1, 4 * hidden_dim)),  # b_ih + b_hh combined
            "w_ih_b": uni(next(k_iter), (in_dim, 4 * hidden_dim)),
            "w_hh_b": uni(next(k_iter), (hidden_dim, 4 * hidden_dim)),
            "b_b":    uni(next(k_iter), (1, 4 * hidden_dim)),
        })

    fc_w = uni(next(k_iter), (2 * hidden_dim, output_dim))
    fc_b = uni(next(k_iter), (1, output_dim))
    return {"embedding": emb, "lstm": lstm_params, "fc_w": fc_w, "fc_b": fc_b}


def prepare_params(params):
    """Concatenate per-direction input weights/biases along the gate axis once
    (outside jit) so each layer does one hoisted 8H-wide input projection."""
    kp = {"embedding": params["embedding"],
          "fc_w": params["fc_w"], "fc_b": params["fc_b"], "lstm": []}
    for li, p in enumerate(params["lstm"]):
        H = p["w_hh_f"].shape[0]
        w_in = jnp.concatenate([p["w_ih_f"], p["w_ih_b"]], axis=1)   # (Din, 8H)
        b_in = jnp.concatenate([p["b_f"], p["b_b"]], axis=1)         # (1, 8H)
        entry = {"w_hh_f": p["w_hh_f"], "w_hh_b": p["w_hh_b"], "b_in": b_in}
        if li == 0:
            entry["w_in"] = w_in
        else:
            entry["w_in_f"] = w_in[:H]      # multiplies previous fwd hiddens
            entry["w_in_b"] = w_in[H:]      # multiplies previous bwd hiddens
        kp["lstm"].append(entry)
    return kp


# ----------------------------------------------------------------------------
# Pure-JAX reference (for sanity checking the Pallas kernels)
# ----------------------------------------------------------------------------
def _lstm_dir_ref(x, w_ih, w_hh, b):
    _, B, _ = x.shape
    H = w_hh.shape[0]

    def step(carry, x_t):
        h, c = carry
        g = x_t @ w_ih + h @ w_hh + b[0]
        i = jax.nn.sigmoid(g[:, 0 * H:1 * H])
        f = jax.nn.sigmoid(g[:, 1 * H:2 * H])
        gg = jnp.tanh(g[:, 2 * H:3 * H])
        o = jax.nn.sigmoid(g[:, 3 * H:4 * H])
        c = f * c + i * gg
        h = o * jnp.tanh(c)
        return (h, c), h

    (h_fin, c_fin), h_seq = jax.lax.scan(
        step, (jnp.zeros((B, H)), jnp.zeros((B, H))), x)
    return h_seq, h_fin, c_fin


def bilstm_forward_ref(text, params, n_layers):
    emb = jnp.take(params["embedding"], text, axis=0)
    layer_in = emb
    h_fwd_last = h_bwd_last = None
    for layer in range(n_layers):
        p = params["lstm"][layer]
        hf, hff, _ = _lstm_dir_ref(layer_in, p["w_ih_f"], p["w_hh_f"], p["b_f"])
        hbr, hfb, _ = _lstm_dir_ref(layer_in[::-1], p["w_ih_b"], p["w_hh_b"], p["b_b"])
        layer_in = jnp.concatenate([hf, hbr[::-1]], axis=-1)
        h_fwd_last, h_bwd_last = hff, hfb
    hidden = jnp.concatenate([h_fwd_last, h_bwd_last], axis=-1)
    return hidden @ params["fc_w"] + params["fc_b"][0]


if __name__ == "__main__":
    # Small, module-consistent shapes
    vocab_size = 50
    embedding_dim = 32
    hidden_dim = 32
    output_dim = 4
    n_layers = 2
    pad_idx = 0
    seq_len = 8
    batch = 2

    key = jax.random.PRNGKey(0)
    k_params, k_text = jax.random.split(key)

    params = init_params(k_params, vocab_size, embedding_dim, hidden_dim,
                         output_dim, n_layers, pad_idx)
    kparams = prepare_params(params)
    text = jax.random.randint(k_text, (seq_len, batch), 0, vocab_size,
                              dtype=jnp.int32)

    fwd = jax.jit(bilstm_forward)
    out = fwd(text, kparams)
    jax.block_until_ready(out)

    ref = bilstm_forward_ref(text, params, n_layers)
    assert out.shape == (batch, output_dim)
    assert jnp.allclose(out, ref, atol=1e-4, rtol=1e-4)

    print("KERNEL_OK")
</pallas_src>

<mosaic_0001>
module attributes {stable_mosaic.version = 11 : i64} {
  func.func @_gate_proj_kernel(%arg0: memref<64x32xf32, #tpu.memory_space<vmem>>, %arg1: memref<32x256xf32, #tpu.memory_space<vmem>>, %arg2: memref<1x256xf32, #tpu.memory_space<vmem>>, %arg3: memref<64x256xf32, #tpu.memory_space<vmem>>) attributes {dimension_semantics = [], scalar_prefetch = 0 : i64, scratch_operands = 0 : i64, tpu.core_type = #tpu.core_type<tc>} {
    %c0 = arith.constant 0 : index
    %c0_0 = arith.constant 0 : index
    %0 = vector.load %arg0[%c0, %c0_0] : memref<64x32xf32, #tpu.memory_space<vmem>>, vector<64x32xf32>
    %c0_1 = arith.constant 0 : index
    %c0_2 = arith.constant 0 : index
    %1 = vector.load %arg1[%c0_1, %c0_2] : memref<32x256xf32, #tpu.memory_space<vmem>>, vector<32x256xf32>
    %cst = arith.constant dense<0.000000e+00> : vector<64x256xf32>
    %2 = tpu.matmul %0, %1, %cst {dimension_numbers = #tpu.dot_dimension_numbers<[1], [0], [0], [1], [0, 0, 1, 1], [], []>} : vector<64x32xf32>, vector<32x256xf32>, vector<64x256xf32> -> vector<64x256xf32>
    %c0_3 = arith.constant 0 : index
    %c0_4 = arith.constant 0 : index
    %3 = vector.load %arg2[%c0_3, %c0_4] : memref<1x256xf32, #tpu.memory_space<vmem>>, vector<1x256xf32>
    %4 = vector.broadcast %3 : vector<1x256xf32> to vector<64x256xf32>
    %5 = arith.addf %2, %4 : vector<64x256xf32>
    %c0_5 = arith.constant 0 : index
    %c0_6 = arith.constant 0 : index
    %6 = vector.load %arg3[%c0_5, %c0_6] : memref<64x256xf32, #tpu.memory_space<vmem>>, vector<64x256xf32>
    tpu.vector_store %arg3[%c0_5, %c0_6], %5 {strides = array<i32>} : memref<64x256xf32, #tpu.memory_space<vmem>>, vector<64x256xf32>,
    return
  }
}

module attributes {stable_mosaic.version = 11 : i64} {
  func.func @_gate_proj2_kernel(%arg0: memref<64x32xf32, #tpu.memory_space<vmem>>, %arg1: memref<64x32xf32, #tpu.memory_space<vmem>>, %arg2: memref<32x256xf32, #tpu.memory_space<vmem>>, %arg3: memref<32x256xf32, #tpu.memory_space<vmem>>, %arg4: memref<1x256xf32, #tpu.memory_space<vmem>>, %arg5: memref<64x256xf32, #tpu.memory_space<vmem>>) attributes {dimension_semantics = [], scalar_prefetch = 0 : i64, scratch_operands = 0 : i64, tpu.core_type = #tpu.core_type<tc>} {
    %c0 = arith.constant 0 : index
    %c0_0 = arith.constant 0 : index
    %0 = vector.load %arg0[%c0, %c0_0] : memref<64x32xf32, #tpu.memory_space<vmem>>, vector<64x32xf32>
    %c0_1 = arith.constant 0 : index
    %c0_2 = arith.constant 0 : index
    %1 = vector.load %arg2[%c0_1, %c0_2] : memref<32x256xf32, #tpu.memory_space<vmem>>, vector<32x256xf32>
    %cst = arith.constant dense<0.000000e+00> : vector<64x256xf32>
    %2 = tpu.matmul %0, %1, %cst {dimension_numbers = #tpu.dot_dimension_numbers<[1], [0], [0], [1], [0, 0, 1, 1], [], []>} : vector<64x32xf32>, vector<32x256xf32>, vector<64x256xf32> -> vector<64x256xf32>
    %c0_3 = arith.constant 0 : index
    %c0_4 = arith.constant 0 : index
    %3 = vector.load %arg1[%c0_3, %c0_4] : memref<64x32xf32, #tpu.memory_space<vmem>>, vector<64x32xf32>
    %c0_5 = arith.constant 0 : index
    %c0_6 = arith.constant 0 : index
    %4 = vector.load %arg3[%c0_5, %c0_6] : memref<32x256xf32, #tpu.memory_space<vmem>>, vector<32x256xf32>
    %cst_7 = arith.constant dense<0.000000e+00> : vector<64x256xf32>
    %5 = tpu.matmul %3, %4, %cst_7 {dimension_numbers = #tpu.dot_dimension_numbers<[1], [0], [0], [1], [0, 0, 1, 1], [], []>} : vector<64x32xf32>, vector<32x256xf32>, vector<64x256xf32> -> vector<64x256xf32>
    %6 = arith.addf %2, %5 : vector<64x256xf32>
    %c0_8 = arith.constant 0 : index
    %c0_9 = arith.constant 0 : index
    %7 = vector.load %arg4[%c0_8, %c0_9] : memref<1x256xf32, #tpu.memory_space<vmem>>, vector<1x256xf32>
    %8 = vector.broadcast %7 : vector<1x256xf32> to vector<64x256xf32>
    %9 = arith.addf %6, %8 : vector<64x256xf32>
    %c0_10 = arith.constant 0 : index
    %c0_11 = arith.constant 0 : index
    %10 = vector.load %arg5[%c0_10, %c0_11] : memref<64x256xf32, #tpu.memory_space<vmem>>, vector<64x256xf32>
    tpu.vector_store %arg5[%c0_10, %c0_11], %9 {strides = array<i32>} : memref<64x256xf32, #tpu.memory_space<vmem>>, vector<64x256xf32>,
    return
  }
}

module attributes {stable_mosaic.version = 11 : i64} {
  func.func @_bilstm_rec_kernel(%arg0: memref<8x8x256xf32, #tpu.memory_space<vmem>>, %arg1: memref<32x128xf32, #tpu.memory_space<vmem>>, %arg2: memref<32x128xf32, #tpu.memory_space<vmem>>, %arg3: memref<8x8x32xf32, #tpu.memory_space<vmem>>, %arg4: memref<8x8x32xf32, #tpu.memory_space<vmem>>, %arg5: memref<8x32xf32, #tpu.memory_space<vmem>>, %arg6: memref<8x32xf32, #tpu.memory_space<vmem>>) attributes {dimension_semantics = [], scalar_prefetch = 0 : i64, scratch_operands = 0 : i64, tpu.core_type = #tpu.core_type<tc>} {
    %cst = arith.constant 0.000000e+00 : f32
    %0 = vector.broadcast %cst : f32 to vector<8x32xf32>
    %c0_i32 = arith.constant 0 : i32
    %c8_i32 = arith.constant 8 : i32
    %1 = arith.addi %c0_i32, %c8_i32 : i32
    %c1_i32 = arith.constant 1 : i32
    %2:4 = scf.for %arg7 = %c0_i32 to %1 step %c1_i32 iter_args(%arg8 = %0, %arg9 = %0, %arg10 = %0, %arg11 = %0) -> (vector<8x32xf32>, vector<8x32xf32>, vector<8x32xf32>, vector<8x32xf32>)  : i32 {
      %c7_i32 = arith.constant 7 : i32
      %5 = arith.subi %c7_i32, %arg7 : i32
      %6 = arith.index_cast %arg7 : i32 to index
      %c0_4 = arith.constant 0 : index
      %c0_5 = arith.constant 0 : index
      %7 = vector.load %arg0[%6, %c0_4, %c0_5] : memref<8x8x256xf32, #tpu.memory_space<vmem>>, vector<1x8x256xf32>
      %8 = vector.shape_cast %7 : vector<1x8x256xf32> to vector<8x256xf32>
      %9 = arith.index_cast %5 : i32 to index
      %c0_6 = arith.constant 0 : index
      %c0_7 = arith.constant 0 : index
      %10 = vector.load %arg0[%9, %c0_6, %c0_7] : memref<8x8x256xf32, #tpu.memory_space<vmem>>, vector<1x8x256xf32>
      %11 = vector.shape_cast %10 : vector<1x8x256xf32> to vector<8x256xf32>
      %12 = vector.extract_strided_slice %8 {offsets = [0, 0], sizes = [8, 128], strides = [1, 1]} : vector<8x256xf32> to vector<8x128xf32>
      %c0_8 = arith.constant 0 : index
      %c0_9 = arith.constant 0 : index
      %13 = vector.load %arg1[%c0_8, %c0_9] : memref<32x128xf32, #tpu.memory_space<vmem>>, vector<32x128xf32>
      %cst_10 = arith.constant dense<0.000000e+00> : vector<8x128xf32>
      %14 = tpu.matmul %arg8, %13, %cst_10 {dimension_numbers = #tpu.dot_dimension_numbers<[1], [0], [0], [1], [0, 0, 1, 1], [], []>} : vector<8x32xf32>, vector<32x128xf32>, vector<8x128xf32> -> vector<8x128xf32>
      %15 = arith.addf %12, %14 : vector<8x128xf32>
      %16 = vector.extract_strided_slice %11 {offsets = [0, 128], sizes = [8, 128], strides = [1, 1]} : vector<8x256xf32> to vector<8x128xf32>
      %c0_11 = arith.constant 0 : index
      %c0_12 = arith.constant 0 : index
      %17 = vector.load %arg2[%c0_11, %c0_12] : memref<32x128xf32, #tpu.memory_space<vmem>>, vector<32x128xf32>
      %cst_13 = arith.constant dense<0.000000e+00> : vector<8x128xf32>
      %18 = tpu.matmul %arg10, %17, %cst_13 {dimension_numbers = #tpu.dot_dimension_numbers<[1], [0], [0], [1], [0, 0, 1, 1], [], []>} : vector<8x32xf32>, vector<32x128xf32>, vector<8x128xf32> -> vector<8x128xf32>
      %19 = arith.addf %16, %18 : vector<8x128xf32>
      %20 = vector.extract_strided_slice %15 {offsets = [0, 0], sizes = [8, 32], strides = [1, 1]} : vector<8x128xf32> to vector<8x32xf32>
      %21 = arith.negf %20 : vector<8x32xf32>
      %22 = math.exp %21 : vector<8x32xf32>
      %cst_14 = arith.constant 1.000000e+00 : f32
      %23 = vector.broadcast %cst_14 : f32 to vector<8x32xf32>
      %24 = arith.addf %23, %22 : vector<8x32xf32>
      %25 = arith.divf %23, %24 : vector<8x32xf32>
      %26 = vector.extract_strided_slice %15 {offsets = [0, 32], sizes = [8, 32], strides = [1, 1]} : vector<8x128xf32> to vector<8x32xf32>
      %27 = arith.negf %26 : vector<8x32xf32>
      %28 = math.exp %27 : vector<8x32xf32>
      %cst_15 = arith.constant 1.000000e+00 : f32
      %29 = vector.broadcast %cst_15 : f32 to vector<8x32xf32>
      %30 = arith.addf %29, %28 : vector<8x32xf32>
      %31 = arith.divf %29, %30 : vector<8x32xf32>
      %32 = vector.extract_strided_slice %15 {offsets = [0, 64], sizes = [8, 32], strides = [1, 1]} : vector<8x128xf32> to vector<8x32xf32>
      %33 = math.tanh %32 : vector<8x32xf32>
      %34 = vector.extract_strided_slice %15 {offsets = [0, 96], sizes = [8, 32], strides = [1, 1]} : vector<8x128xf32> to vector<8x32xf32>
      %35 = arith.negf %34 : vector<8x32xf32>
      %36 = math.exp %35 : vector<8x32xf32>
      %cst_16 = arith.constant 1.000000e+00 : f32
      %37 = vector.broadcast %cst_16 : f32 to vector<8x32xf32>
      %38 = arith.addf %37, %36 : vector<8x32xf32>
      %39 = arith.divf %37, %38 : vector<8x32xf32>
      %40 = arith.mulf %31, %arg9 : vector<8x32xf32>
      %41 = arith.mulf %25, %33 : vector<8x32xf32>
      %42 = arith.addf %40, %41 : vector<8x32xf32>
      %43 = math.tanh %42 : vector<8x32xf32>
      %44 = arith.mulf %39, %43 : vector<8x32xf32>
      %45 = vector.extract_strided_slice %19 {offsets = [0, 0], sizes = [8, 32], strides = [1, 1]} : vector<8x128xf32> to vector<8x32xf32>
      %46 = arith.negf %45 : vector<8x32xf32>
      %47 = math.exp %46 : vector<8x32xf32>
      %cst_17 = arith.constant 1.000000e+00 : f32
      %48 = vector.broadcast %cst_17 : f32 to vector<8x32xf32>
      %49 = arith.addf %48, %47 : vector<8x32xf32>
      %50 = arith.divf %48, %49 : vector<8x32xf32>
      %51 = vector.extract_strided_slice %19 {offsets = [0, 32], sizes = [8, 32], strides = [1, 1]} : vector<8x128xf32> to vector<8x32xf32>
      %52 = arith.negf %51 : vector<8x32xf32>
      %53 = math.exp %52 : vector<8x32xf32>
      %cst_18 = arith.constant 1.000000e+00 : f32
      %54 = vector.broadcast %cst_18 : f32 to vector<8x32xf32>
      %55 = arith.addf %54, %53 : vector<8x32xf32>
      %56 = arith.divf %54, %55 : vector<8x32xf32>
      %57 = vector.extract_strided_slice %19 {offsets = [0, 64], sizes = [8, 32], strides = [1, 1]} : vector<8x128xf32> to vector<8x32xf32>
      %58 = math.tanh %57 : vector<8x32xf32>
      %59 = vector.extract_strided_slice %19 {offsets = [0, 96], sizes = [8, 32], strides = [1, 1]} : vector<8x128xf32> to vector<8x32xf32>
      %60 = arith.negf %59 : vector<8x32xf32>
      %61 = math.exp %60 : vector<8x32xf32>
      %cst_19 = arith.constant 1.000000e+00 : f32
      %62 = vector.broadcast %cst_19 : f32 to vector<8x32xf32>
      %63 = arith.addf %62, %61 : vector<8x32xf32>
      %64 = arith.divf %62, %63 : vector<8x32xf32>
      %65 = arith.mulf %56, %arg11 : vector<8x32xf32>
      %66 = arith.mulf %50, %58 : vector<8x32xf32>
      %67 = arith.addf %65, %66 : vector<8x32xf32>
      %68 = math.tanh %67 : vector<8x32xf32>
      %69 = arith.mulf %64, %68 : vector<8x32xf32>
      %70 = arith.index_cast %arg7 : i32 to index
      %c0_20 = arith.constant 0 : index
      %c0_21 = arith.constant 0 : index
      %71 = vector.load %arg3[%70, %c0_20, %c0_21] : memref<8x8x32xf32, #tpu.memory_space<vmem>>, vector<1x8x32xf32>
      %72 = vector.shape_cast %71 : vector<1x8x32xf32> to vector<8x32xf32>
      %73 = vector.shape_cast %44 : vector<8x32xf32> to vector<1x8x32xf32>
      tpu.vector_store %arg3[%70, %c0_20, %c0_21], %73 {strides = array<i32>} : memref<8x8x32xf32, #tpu.memory_space<vmem>>, vector<1x8x32xf32>,
      %74 = arith.index_cast %5 : i32 to index
      %c0_22 = arith.constant 0 : index
      %c0_23 = arith.constant 0 : index
      %75 = vector.load %arg4[%74, %c0_22, %c0_23] : memref<8x8x32xf32, #tpu.memory_space<vmem>>, vector<1x8x32xf32>
      %76 = vector.shape_cast %75 : vector<1x8x32xf32> to vector<8x32xf32>
      %77 = vector.shape_cast %69 : vector<8x32xf32> to vector<1x8x32xf32>
      tpu.vector_store %arg4[%74, %c0_22, %c0_23], %77 {strides = array<i32>} : memref<8x8x32xf32, #tpu.memory_space<vmem>>, vector<1x8x32xf32>,
      scf.yield %44, %42, %69, %67 : vector<8x32xf32>, vector<8x32xf32>, vector<8x32xf32>, vector<8x32xf32>
    }
    %c8_i32_0 = arith.constant 8 : i32
    %c0 = arith.constant 0 : index
    %c0_1 = arith.constant 0 : index
    %3 = vector.load %arg5[%c0, %c0_1] : memref<8x32xf32, #tpu.memory_space<vmem>>, vector<8x32xf32>
    tpu.vector_store %arg5[%c0, %c0_1], %2#0 {strides = array<i32>} : memref<8x32xf32, #tpu.memory_space<vmem>>, vector<8x32xf32>,
    %c0_2 = arith.constant 0 : index
    %c0_3 = arith.constant 0 : index
    %4 = vector.load %arg6[%c0_2, %c0_3] : memref<8x32xf32, #tpu.memory_space<vmem>>, vector<8x32xf32>
    tpu.vector_store %arg6[%c0_2, %c0_3], %2#2 {strides = array<i32>} : memref<8x32xf32, #tpu.memory_space<vmem>>, vector<8x32xf32>,
    return
  }
}

module attributes {stable_mosaic.version = 11 : i64} {
  func.func @_bilstm_rec_kernel(%arg0: memref<8x8x256xf32, #tpu.memory_space<vmem>>, %arg1: memref<32x128xf32, #tpu.memory_space<vmem>>, %arg2: memref<32x128xf32, #tpu.memory_space<vmem>>, %arg3: memref<8x8x32xf32, #tpu.memory_space<vmem>>, %arg4: memref<8x8x32xf32, #tpu.memory_space<vmem>>, %arg5: memref<8x32xf32, #tpu.memory_space<vmem>>, %arg6: memref<8x32xf32, #tpu.memory_space<vmem>>) attributes {dimension_semantics = [], scalar_prefetch = 0 : i64, scratch_operands = 0 : i64, tpu.core_type = #tpu.core_type<tc>} {
    %cst = arith.constant 0.000000e+00 : f32
    %0 = vector.broadcast %cst : f32 to vector<8x32xf32>
    %c0_i32 = arith.constant 0 : i32
    %c8_i32 = arith.constant 8 : i32
    %1 = arith.addi %c0_i32, %c8_i32 : i32
    %c1_i32 = arith.constant 1 : i32
    %2:4 = scf.for %arg7 = %c0_i32 to %1 step %c1_i32 iter_args(%arg8 = %0, %arg9 = %0, %arg10 = %0, %arg11 = %0) -> (vector<8x32xf32>, vector<8x32xf32>, vector<8x32xf32>, vector<8x32xf32>)  : i32 {
      %c7_i32 = arith.constant 7 : i32
      %5 = arith.subi %c7_i32, %arg7 : i32
      %6 = arith.index_cast %arg7 : i32 to index
      %c0_4 = arith.constant 0 : index
      %c0_5 = arith.constant 0 : index
      %7 = vector.load %arg0[%6, %c0_4, %c0_5] : memref<8x8x256xf32, #tpu.memory_space<vmem>>, vector<1x8x256xf32>
      %8 = vector.shape_cast %7 : vector<1x8x256xf32> to vector<8x256xf32>
      %9 = arith.index_cast %5 : i32 to index
      %c0_6 = arith.constant 0 : index
      %c0_7 = arith.constant 0 : index
      %10 = vector.load %arg0[%9, %c0_6, %c0_7] : memref<8x8x256xf32, #tpu.memory_space<vmem>>, vector<1x8x256xf32>
      %11 = vector.shape_cast %10 : vector<1x8x256xf32> to vector<8x256xf32>
      %12 = vector.extract_strided_slice %8 {offsets = [0, 0], sizes = [8, 128], strides = [1, 1]} : vector<8x256xf32> to vector<8x128xf32>
      %c0_8 = arith.constant 0 : index
      %c0_9 = arith.constant 0 : index
      %13 = vector.load %arg1[%c0_8, %c0_9] : memref<32x128xf32, #tpu.memory_space<vmem>>, vector<32x128xf32>
      %cst_10 = arith.constant dense<0.000000e+00> : vector<8x128xf32>
      %14 = tpu.matmul %arg8, %13, %cst_10 {dimension_numbers = #tpu.dot_dimension_numbers<[1], [0], [0], [1], [0, 0, 1, 1], [], []>} : vector<8x32xf32>, vector<32x128xf32>, vector<8x128xf32> -> vector<8x128xf32>
      %15 = arith.addf %12, %14 : vector<8x128xf32>
      %16 = vector.extract_strided_slice %11 {offsets = [0, 128], sizes = [8, 128], strides = [1, 1]} : vector<8x256xf32> to vector<8x128xf32>
      %c0_11 = arith.constant 0 : index
      %c0_12 = arith.constant 0 : index
      %17 = vector.load %arg2[%c0_11, %c0_12] : memref<32x128xf32, #tpu.memory_space<vmem>>, vector<32x128xf32>
      %cst_13 = arith.constant dense<0.000000e+00> : vector<8x128xf32>
      %18 = tpu.matmul %arg10, %17, %cst_13 {dimension_numbers = #tpu.dot_dimension_numbers<[1], [0], [0], [1], [0, 0, 1, 1], [], []>} : vector<8x32xf32>, vector<32x128xf32>, vector<8x128xf32> -> vector<8x128xf32>
      %19 = arith.addf %16, %18 : vector<8x128xf32>
      %20 = vector.extract_strided_slice %15 {offsets = [0, 0], sizes = [8, 32], strides = [1, 1]} : vector<8x128xf32> to vector<8x32xf32>
      %21 = arith.negf %20 : vector<8x32xf32>
      %22 = math.exp %21 : vector<8x32xf32>
      %cst_14 = arith.constant 1.000000e+00 : f32
      %23 = vector.broadcast %cst_14 : f32 to vector<8x32xf32>
      %24 = arith.addf %23, %22 : vector<8x32xf32>
      %25 = arith.divf %23, %24 : vector<8x32xf32>
      %26 = vector.extract_strided_slice %15 {offsets = [0, 32], sizes = [8, 32], strides = [1, 1]} : vector<8x128xf32> to vector<8x32xf32>
      %27 = arith.negf %26 : vector<8x32xf32>
      %28 = math.exp %27 : vector<8x32xf32>
      %cst_15 = arith.constant 1.000000e+00 : f32
      %29 = vector.broadcast %cst_15 : f32 to vector<8x32xf32>
      %30 = arith.addf %29, %28 : vector<8x32xf32>
      %31 = arith.divf %29, %30 : vector<8x32xf32>
      %32 = vector.extract_strided_slice %15 {offsets = [0, 64], sizes = [8, 32], strides = [1, 1]} : vector<8x128xf32> to vector<8x32xf32>
      %33 = math.tanh %32 : vector<8x32xf32>
      %34 = vector.extract_strided_slice %15 {offsets = [0, 96], sizes = [8, 32], strides = [1, 1]} : vector<8x128xf32> to vector<8x32xf32>
      %35 = arith.negf %34 : vector<8x32xf32>
      %36 = math.exp %35 : vector<8x32xf32>
      %cst_16 = arith.constant 1.000000e+00 : f32
      %37 = vector.broadcast %cst_16 : f32 to vector<8x32xf32>
      %38 = arith.addf %37, %36 : vector<8x32xf32>
      %39 = arith.divf %37, %38 : vector<8x32xf32>
      %40 = arith.mulf %31, %arg9 : vector<8x32xf32>
      %41 = arith.mulf %25, %33 : vector<8x32xf32>
      %42 = arith.addf %40, %41 : vector<8x32xf32>
      %43 = math.tanh %42 : vector<8x32xf32>
      %44 = arith.mulf %39, %43 : vector<8x32xf32>
      %45 = vector.extract_strided_slice %19 {offsets = [0, 0], sizes = [8, 32], strides = [1, 1]} : vector<8x128xf32> to vector<8x32xf32>
      %46 = arith.negf %45 : vector<8x32xf32>
      %47 = math.exp %46 : vector<8x32xf32>
      %cst_17 = arith.constant 1.000000e+00 : f32
      %48 = vector.broadcast %cst_17 : f32 to vector<8x32xf32>
      %49 = arith.addf %48, %47 : vector<8x32xf32>
      %50 = arith.divf %48, %49 : vector<8x32xf32>
      %51 = vector.extract_strided_slice %19 {offsets = [0, 32], sizes = [8, 32], strides = [1, 1]} : vector<8x128xf32> to vector<8x32xf32>
      %52 = arith.negf %51 : vector<8x32xf32>
      %53 = math.exp %52 : vector<8x32xf32>
      %cst_18 = arith.constant 1.000000e+00 : f32
      %54 = vector.broadcast %cst_18 : f32 to vector<8x32xf32>
      %55 = arith.addf %54, %53 : vector<8x32xf32>
      %56 = arith.divf %54, %55 : vector<8x32xf32>
      %57 = vector.extract_strided_slice %19 {offsets = [0, 64], sizes = [8, 32], strides = [1, 1]} : vector<8x128xf32> to vector<8x32xf32>
      %58 = math.tanh %57 : vector<8x32xf32>
      %59 = vector.extract_strided_slice %19 {offsets = [0, 96], sizes = [8, 32], strides = [1, 1]} : vector<8x128xf32> to vector<8x32xf32>
      %60 = arith.negf %59 : vector<8x32xf32>
      %61 = math.exp %60 : vector<8x32xf32>
      %cst_19 = arith.constant 1.000000e+00 : f32
      %62 = vector.broadcast %cst_19 : f32 to vector<8x32xf32>
      %63 = arith.addf %62, %61 : vector<8x32xf32>
      %64 = arith.divf %62, %63 : vector<8x32xf32>
      %65 = arith.mulf %56, %arg11 : vector<8x32xf32>
      %66 = arith.mulf %50, %58 : vector<8x32xf32>
      %67 = arith.addf %65, %66 : vector<8x32xf32>
      %68 = math.tanh %67 : vector<8x32xf32>
      %69 = arith.mulf %64, %68 : vector<8x32xf32>
      %70 = arith.index_cast %arg7 : i32 to index
      %c0_20 = arith.constant 0 : index
      %c0_21 = arith.constant 0 : index
      %71 = vector.load %arg3[%70, %c0_20, %c0_21] : memref<8x8x32xf32, #tpu.memory_space<vmem>>, vector<1x8x32xf32>
      %72 = vector.shape_cast %71 : vector<1x8x32xf32> to vector<8x32xf32>
      %73 = vector.shape_cast %44 : vector<8x32xf32> to vector<1x8x32xf32>
      tpu.vector_store %arg3[%70, %c0_20, %c0_21], %73 {strides = array<i32>} : memref<8x8x32xf32, #tpu.memory_space<vmem>>, vector<1x8x32xf32>,
      %74 = arith.index_cast %5 : i32 to index
      %c0_22 = arith.constant 0 : index
      %c0_23 = arith.constant 0 : index
      %75 = vector.load %arg4[%74, %c0_22, %c0_23] : memref<8x8x32xf32, #tpu.memory_space<vmem>>, vector<1x8x32xf32>
      %76 = vector.shape_cast %75 : vector<1x8x32xf32> to vector<8x32xf32>
      %77 = vector.shape_cast %69 : vector<8x32xf32> to vector<1x8x32xf32>
      tpu.vector_store %arg4[%74, %c0_22, %c0_23], %77 {strides = array<i32>} : memref<8x8x32xf32, #tpu.memory_space<vmem>>, vector<1x8x32xf32>,
      scf.yield %44, %42, %69, %67 : vector<8x32xf32>, vector<8x32xf32>, vector<8x32xf32>, vector<8x32xf32>
    }
    %c8_i32_0 = arith.constant 8 : i32
    %c0 = arith.constant 0 : index
    %c0_1 = arith.constant 0 : index
    %3 = vector.load %arg5[%c0, %c0_1] : memref<8x32xf32, #tpu.memory_space<vmem>>, vector<8x32xf32>
    tpu.vector_store %arg5[%c0, %c0_1], %2#0 {strides = array<i32>} : memref<8x32xf32, #tpu.memory_space<vmem>>, vector<8x32xf32>,
    %c0_2 = arith.constant 0 : index
    %c0_3 = arith.constant 0 : index
    %4 = vector.load %arg6[%c0_2, %c0_3] : memref<8x32xf32, #tpu.memory_space<vmem>>, vector<8x32xf32>
    tpu.vector_store %arg6[%c0_2, %c0_3], %2#2 {strides = array<i32>} : memref<8x32xf32, #tpu.memory_space<vmem>>, vector<8x32xf32>,
    return
  }
}

</mosaic_0001>

<bundles_post_ra>
// kernel: bilstm_forward.4
= control target key start
LH: loop header
LB: loop body
LE: loop exit
PB: predicated region body
PF: predicated region fallthrough
CT: control target
= control target key end

     0   :  { %vm36_vm0 = vcmask 261120   ;;  %s322_s1 = inlined_call_operand.vmem [shape: f32[32,256], index: 1, kind: input, shape index: {}]   ;;  %s323_s0 = inlined_call_operand.vmem [shape: f32[64,32], index: 0, kind: input, shape index: {}]   ;;  %s324_s2 = inlined_call_operand.vmem [shape: f32[1,256], index: 2, kind: input, shape index: {}]   ;;  %s325_s3 = inlined_call_operand.vmem [shape: f32[64,256], index: 3, kind: output, shape index: {}]  }
   0x1   :  { %v28_v0 = vld [vmem:[%s322_s1 + $0x30] sm:$0xff]  ;;  %v29_v1 = vld [vmem:[%s322_s1 + $0x38] sm:$0xff]  ;;  %v26_v2 = vld [vmem:[%s322_s1 + $0x20] sm:$0xff] }
   0x2   :  { %179 = vmatpush.msra.mxu2 %v28_v0  ;;  %183 = vmatpush.msra.mxu3 %v29_v1  ;;  %v27_v3 = vld [vmem:[%s322_s1 + $0x28] sm:$0xff]  ;;  %v24_v4 = vld [vmem:[%s322_s1 + $0x10] sm:$0xff]  ;;  %v25_v5 = vld [vmem:[%s322_s1 + $0x18] sm:$0xff] }
   0x3   :  { %73 = vmatpush.msra.mxu0 %v28_v0  ;;  %114 = vmatpush.msra.mxu1 %v29_v1  ;;  %v22_v6 = vld [vmem:[%s322_s1] sm:$0xff]  ;;  %v23_v7 = vld [vmem:[%s322_s1 + $0x8] sm:$0xff]  ;;  %v20_v12 = vld [vmem:[%s323_s0 + $0x30] sm:$0xff] }
   0x4   :  { %180 = vmatpush.msra.mxu2 %v26_v2  ;;  %184 = vmatpush.msra.mxu3 %v27_v3  ;;  %v18_v8 = vld [vmem:[%s323_s0 + $0x20] sm:$0xff]  ;;  %v19_v10 = vld [vmem:[%s323_s0 + $0x28] sm:$0xff]  ;;  %v16_v13 = vld [vmem:[%s323_s0 + $0x10] sm:$0xff] }
   0x5   :  { %74 = vmatpush.msra.mxu0 %v26_v2  ;;  %115 = vmatpush.msra.mxu1 %v27_v3  ;;  %v14_v9 = vld [vmem:[%s323_s0] sm:$0xff]  ;;  %v15_v11 = vld [vmem:[%s323_s0 + $0x8] sm:$0xff]  ;;  %v21_v14 = vld [vmem:[%s323_s0 + $0x38] sm:$0xff] }
   0x6   :  { %181 = vmatpush.msra.mxu2 %v24_v4  ;;  %185 = vmatpush.msra.mxu3 %v25_v5  ;;  %v17_v15 = vld [vmem:[%s323_s0 + $0x18] sm:$0xff]  ;;  %v30_v16 = vld [vmem:[%s324_s2] sm:$0x3] }
   0x7   :  { %75 = vmatpush.msra.mxu0 %v24_v4  ;;  %116 = vmatpush.msra.mxu1 %v25_v5  ;;  %v32_v17 = vperm.slane %v30_v16, 0  ;;  %v33_v18 = vperm.slane %v30_v16, 1 }
   0x8   :  { %182 = vmatpush.msra.mxu2 %v22_v6  ;;  %186 = vmatpush.msra.mxu3 %v23_v7 }
   0x9   :  { %167 = vmatmul.msk.f32.vlgmr.msra.gmra.mxu2 %vm36_vm0, %v18_v8  ;;  %175 = vmatmul.msk.f32.vlgmr.msra.gmra.mxu3 %vm36_vm0, %v18_v8 }
   0xa   :  { %76 = vmatpush.msra.mxu0 %v22_v6  ;;  %117 = vmatpush.msra.mxu1 %v23_v7 }
   0xb   :  { %163 = vmatmul.msk.f32.vlgmr.msra.gmra.mxu0 %vm36_vm0, %v14_v9  ;;  %171 = vmatmul.msk.f32.vlgmr.msra.gmra.mxu1 %vm36_vm0, %v14_v9 }
  0x11   :  { %168 = vmatmul.msk.f32.gmra.mxu2 %vm36_vm0, %v19_v10  ;;  %176 = vmatmul.msk.f32.gmra.mxu3 %vm36_vm0, %v19_v10 }
  0x13   :  { %164 = vmatmul.msk.f32.gmra.mxu0 %vm36_vm0, %v15_v11  ;;  %172 = vmatmul.msk.f32.gmra.mxu1 %vm36_vm0, %v15_v11 }
  0x19   :  { %169 = vmatmul.msk.f32.gmra.mxu2 %vm36_vm0, %v20_v12  ;;  %177 = vmatmul.msk.f32.gmra.mxu3 %vm36_vm0, %v20_v12 }
  0x1b   :  { %165 = vmatmul.msk.f32.gmra.mxu0 %vm36_vm0, %v16_v13  ;;  %173 = vmatmul.msk.f32.gmra.mxu1 %vm36_vm0, %v16_v13 }
  0x21   :  { %170 = vmatmul.msk.f32.gmra.mxu2 %vm36_vm0, %v21_v14  ;;  %178 = vmatmul.msk.f32.gmra.mxu3 %vm36_vm0, %v21_v14 }
  0x23   :  { %166 = vmatmul.msk.f32.gmra.mxu0 %vm36_vm0, %v17_v15  ;;  %174 = vmatmul.msk.f32.gmra.mxu1 %vm36_vm0, %v17_v15 }
  0x88   :  { %v78_v19 = vpop.f32.mrf.mxu0  ;;  %v119_v20 = vpop.f32.mrf.mxu1 }
  0x89   :  { %v79_v21 = vadd.f32 %v78_v19, %v32_v17  ;;  %v120_v22 = vadd.f32 %v119_v20, %v33_v18 }
  0x8b   :  { %143 = vst [vmem:[%s325_s3] sm:$0xff] %v79_v21 }
  0x8c   :  { %v90_v23 = vpop.f32.mrf.mxu2  ;;  %144 = vst [vmem:[%s325_s3 + $0x8] sm:$0xff] %v120_v22  ;;  %v131_v24 = vpop.f32.mrf.mxu3 }
  0x8d   :  { %v91_v25 = vadd.f32 %v90_v23, %v32_v17  ;;  %v132_v26 = vadd.f32 %v131_v24, %v33_v18 }
  0x8f   :  { %151 = vst [vmem:[%s325_s3 + $0x40] sm:$0xff] %v91_v25 }
  0x90   :  { %152 = vst [vmem:[%s325_s3 + $0x48] sm:$0xff] %v132_v26  ;;  %v81_v27 = vpop.f32.mrf.mxu0  ;;  %v122_v28 = vpop.f32.mrf.mxu1 }
  0x91   :  { %v82_v29 = vadd.f32 %v81_v27, %v32_v17  ;;  %v123_v30 = vadd.f32 %v122_v28, %v33_v18 }
  0x93   :  { %145 = vst [vmem:[%s325_s3 + $0x10] sm:$0xff] %v82_v29 }
  0x94   :  { %v93_v31 = vpop.f32.mrf.mxu2  ;;  %146 = vst [vmem:[%s325_s3 + $0x18] sm:$0xff] %v123_v30  ;;  %v134_v32 = vpop.f32.mrf.mxu3 }
  0x95   :  { %v94_v33 = vadd.f32 %v93_v31, %v32_v17  ;;  %v135_v34 = vadd.f32 %v134_v32, %v33_v18 }
  0x97   :  { %153 = vst [vmem:[%s325_s3 + $0x50] sm:$0xff] %v94_v33 }
  0x98   :  { %154 = vst [vmem:[%s325_s3 + $0x58] sm:$0xff] %v135_v34  ;;  %v84_v35 = vpop.f32.mrf.mxu0  ;;  %v125_v36 = vpop.f32.mrf.mxu1 }
  0x99   :  { %v85_v37 = vadd.f32 %v84_v35, %v32_v17  ;;  %v126_v38 = vadd.f32 %v125_v36, %v33_v18 }
  0x9b   :  { %147 = vst [vmem:[%s325_s3 + $0x20] sm:$0xff] %v85_v37 }
  0x9c   :  { %v96_v39 = vpop.f32.mrf.mxu2  ;;  %148 = vst [vmem:[%s325_s3 + $0x28] sm:$0xff] %v126_v38  ;;  %v137_v40 = vpop.f32.mrf.mxu3 }
  0x9d   :  { %v97_v41 = vadd.f32 %v96_v39, %v32_v17  ;;  %v138_v42 = vadd.f32 %v137_v40, %v33_v18 }
  0x9f   :  { %155 = vst [vmem:[%s325_s3 + $0x60] sm:$0xff] %v97_v41 }
  0xa0   :  { %156 = vst [vmem:[%s325_s3 + $0x68] sm:$0xff] %v138_v42  ;;  %v87_v43 = vpop.f32.mrf.mxu0  ;;  %v128_v44 = vpop.f32.mrf.mxu1 }
  0xa1   :  { %v88_v45 = vadd.f32 %v87_v43, %v32_v17  ;;  %v129_v46 = vadd.f32 %v128_v44, %v33_v18 }
  0xa3   :  { %149 = vst [vmem:[%s325_s3 + $0x30] sm:$0xff] %v88_v45 }
  0xa4   :  { %v99_v47 = vpop.f32.mrf.mxu2  ;;  %150 = vst [vmem:[%s325_s3 + $0x38] sm:$0xff] %v129_v46  ;;  %v140_v48 = vpop.f32.mrf.mxu3 }
  0xa5   :  { %v100_v49 = vadd.f32 %v99_v47, %v32_v17  ;;  %v141_v50 = vadd.f32 %v140_v48, %v33_v18 }
  0xa7   :  { %157 = vst [vmem:[%s325_s3 + $0x70] sm:$0xff] %v100_v49 }
  0xa8   :  { %158 = vst [vmem:[%s325_s3 + $0x78] sm:$0xff] %v141_v50 }

// kernel: bilstm_forward.7
= control target key start
LH: loop header
LB: loop body
LE: loop exit
PB: predicated region body
PF: predicated region fallthrough
CT: control target
= control target key end

     0   :  { %12 = vsyncpa [#allocation3], 0  ;;  %s576_s0 = inlined_call_operand.vmem [shape: f32[8,8,256], index: 0, kind: input, shape index: {}]   ;;  %s577_s1 = inlined_call_operand.vmem [shape: f32[32,128], index: 1, kind: input, shape index: {}]   ;;  %s578_s2 = inlined_call_operand.vmem [shape: f32[32,128], index: 2, kind: input, shape index: {}]   ;;  %s579_s3 = inlined_call_operand.hbm [shape: f32[8,8,32], index: 3, kind: output, shape index: {0}]   ;;  %s580_s4 = inlined_call_operand.hbm [shape: f32[8,8,32], index: 4, kind: output, shape index: {1}]   ;;  %s581_s5 = inlined_call_operand.vmem [shape: f32[8,32], index: 5, kind: output, shape index: {2}]   ;;  %s582_s6 = inlined_call_operand.vmem [shape: f32[8,32], index: 6, kind: output, shape index: {3}]  }
   0x1   :  { %13 = vsyncpa [#allocation5], 0  ;;  %v477_v0 = vmov 0.0   ;;  %v479_v1 = vmov 0.0   ;;  %v481_v2 = vmov 0.0   ;;  %v483_v3 = vmov 0.0  }
   0x2   :  { %s485_s21 = smov 0  }
   0x3 LB: > { %v42_v4 = vld [vmem:[%s577_s1 + $0x18] sm:$0xff]  ;;  %v41_v5 = vld [vmem:[%s577_s1 + $0x10] sm:$0xff]  ;;  %s435_s26 = smov 32   ;;  %v40_v6 = vld [vmem:[%s577_s1 + $0x8] sm:$0xff]  ;;  %vm46_vm0 = vcmask 261120   ;;  %s278_s15 = sshll.u32 %s433_s21, 4  ;;  %s433_s21 = sphi %s485_s21, %s25_s21   ;;  %v429_v3 = vphi %v483_v3, %v584_v3   ;;  %v425_v2 = vphi %v481_v2, %v130_v2   ;;  %v421_v1 = vphi %v479_v1, %v583_v1   ;;  %v417_v0 = vphi %v477_v0, %v167_v0  }
   0x4   : > { %61 = vmatpush.msra.mxu0 %v42_v4  ;;  %44 = vrot.lane.b32.xlu0 %v429_v3, %s435_s26  ;;  %v39_v7 = vld [vmem:[%s577_s1] sm:$0xff]  ;;  %v73_v8 = vld [vmem:[%s578_s2 + $0x18] sm:$0xff]  ;;  %v72_v9 = vld [vmem:[%s578_s2 + $0x10] sm:$0xff]  ;;  %s33_s18 = scalar_lea.vmem %s576_s0, %s278_s15  ;;  %s30_s19 = ssub.s32 7, %s433_s21 }
   0x5   : > { %91 = vmatpush.msra.mxu1 %v73_v8  ;;  %v71_v10 = vld [vmem:[%s578_s2 + $0x8] sm:$0xff]  ;;  %v70_v11 = vld [vmem:[%s578_s2] sm:$0xff]  ;;  %s279_s20 = sshll.u32 %s30_s19, 4  ;;  %s436_s25 = smov 64  }
   0x6   : > { %62 = vmatpush.msra.mxu0 %v41_v5  ;;  %v34_v14 = vld [vmem:[%s33_s18] sm:$0xff]  ;;  %s37_s24 = scalar_lea.vmem %s576_s0, %s279_s20  ;;  %s276_s27 = sshll.u32 %s433_s21, 3 }
   0x7   : > { %92 = vmatpush.msra.mxu1 %v72_v9  ;;  %v38_v17 = vld [vmem:[%s37_s24 + $0x8] sm:$0xff]  ;;  %s179_s28 = scalar_lea.vmem [#allocation2], %s276_s27  ;;  %s277_s29 = sshll.u32 %s30_s19, 3 }
   0x8   : > { %63 = vmatpush.msra.mxu0 %v40_v6  ;;  %s186_s30 = scalar_lea.vmem [#allocation4], %s277_s29  ;;  %s25_s21 = sadd.s32 1, %s433_s21  }
   0x9   : > { %93 = vmatpush.msra.mxu1 %v71_v10  ;;  %p22_p0 = scmp.ge.s32.totalorder %s25_s21, 8  }
   0xa   : > { %64 = vmatpush.msra.mxu0 %v39_v7  ;;  %s438_s7 = smov (%p22_p0), [#allocation2]   ;;  %s205_s11 = sshll.u32 (%p22_p0), %s579_s3, 4  ;;  %s206_s11 = int_to_ptr.hbm [resolvable:$true] %s205_s11 }
   0xb   : > { %94 = vmatpush.msra.mxu1 %v70_v11  ;;  %s203_s8 = sshll.u32 (%p22_p0), %s438_s7, 4  ;;  %s439_s12 = smov (%p22_p0), 128   ;;  %s204_s8 = int_to_ptr.vmem [resolvable:$true] %s203_s8 }
   0xc   : > { %75 = vrot.lane.b32.xlu0 %v421_v1, %s435_s26  ;;  %s440_s13 = smov (%p22_p0), 8   ;;  %s218_s16 = sshll.u32 (%p22_p0), %s580_s4, 4  ;;  %s219_s16 = int_to_ptr.hbm [resolvable:$true] %s218_s16 }
   0xd   :  { %s441_s17 = smov (%p22_p0), [#allocation4]  }
   0xe   :  { %s216_s21 = sshll.u32 (%p22_p0), %s441_s17, 4  ;;  %s217_s21 = int_to_ptr.vmem [resolvable:$true] %s216_s21 }
  0x76   : > { %v45_v12 = vpop.permute.xlu0 %44 }
  0x77   : > { %272 = vmatmul.msk.f32.vlgmr.msra.gmra.mxu0 %vm46_vm0, %v45_v12 }
  0x7e   : > { %v76_v13 = vpop.permute.xlu0 %75 }
  0x7f   : > { %273 = vmatmul.msk.f32.vlgmr.msra.gmra.mxu1 %vm46_vm0, %v76_v13 }
  0xf4   : > { %v66_v15 = vpop.f32.mrf.mxu0 }
  0xf5   : > { %v69_v16 = vadd.f32 %v66_v15, %v34_v14 }
  0xf7   : > { %327 = vtanh.f32 %v69_v16  ;;  %v274_v22 = vmul.f32 -1.442695, %v69_v16 }
  0xfc   : > { %v96_v18 = vpop.f32.mrf.mxu1 }
  0xfd   : > { %v328_v19 = vpop.eup %327  ;;  %v99_v20 = vadd.f32 %v96_v18, %v38_v17 }
  0xfe   : > { %122 = vrot.lane.b32.xlu1 %v328_v19, %s436_s25 }
  0xff   : > { %329 = vtanh.f32 %v99_v20  ;;  %v275_v23 = vmul.f32 -1.442695, %v99_v20 }
 0x100   : > { %331 = vpow2.f32 %v274_v22 }
 0x101   : > { %333 = vpow2.f32 %v275_v23 }
 0x105   : > { %v330_v21 = vpop.eup %329 }
 0x106   : > { %159 = vrot.lane.b32.xlu1 %v330_v21, %s436_s25  ;;  %v332_v24 = vpop.eup %331 }
 0x107   : > { %v103_v25 = vadd.f32 1.0, %v332_v24  ;;  %v334_v26 = vpop.eup %333 }
 0x108   : > { %v140_v27 = vadd.f32 1.0, %v334_v26 }
 0x109   : > { %335 = vrcp.f32 %v103_v25  ;;  %v115_v36 = vand.u32 2147483648, %v103_v25  ;;  %vm109_vm2 = vweird.f32 %v103_v25  ;;  %v113_v37 = vand.u32 2147483647, %v103_v25 }
 0x10a   : > { %337 = vrcp.f32 %v140_v27  ;;  %v152_v45 = vand.u32 2147483648, %v140_v27  ;;  %vm146_vm6 = vweird.f32 %v140_v27  ;;  %v150_v46 = vand.u32 2147483647, %v140_v27 }
 0x10b   : > { %v116_v40 = vor.u32 1.1754944e-38, %v115_v36  ;;  %vm114_vm4 = vcmp.eq.f32.partialorder %v113_v37, 8.507059e+37 }
 0x10c   : > { %v153_v48 = vor.u32 1.1754944e-38, %v152_v45  ;;  %vm151_vm8 = vcmp.eq.f32.partialorder %v150_v46, 8.507059e+37 }
 0x10f   : > { %v336_v28 = vpop.eup %335 }
 0x110   : > { %v105_v29 = vmul.f32 %v336_v28, %v103_v25  ;;  %v338_v31 = vpop.eup %337  ;;  %vm110_vm1 = vweird.f32 %v336_v28 }
 0x111   : > { %v142_v33 = vmul.f32 %v338_v31, %v140_v27  ;;  %vm111_vm3 = vmor %vm109_vm2, %vm110_vm1  ;;  %vm147_vm5 = vweird.f32 %v338_v31 }
 0x112   : > { %v106_v30 = vsub.f32 1.0, %v105_v29  ;;  %vm148_vm7 = vmor %vm146_vm6, %vm147_vm5 }
 0x113   : > { %v143_v35 = vsub.f32 1.0, %v142_v33 }
 0x114   : > { %v107_v32 = vmul.f32 %v336_v28, %v106_v30 }
 0x115   : > { %v144_v39 = vmul.f32 %v338_v31, %v143_v35 }
 0x116   : > { %v108_v34 = vadd.f32 %v336_v28, %v107_v32 }
 0x117   : > { %v145_v44 = vadd.f32 %v338_v31, %v144_v39 }
 0x118   : > { %v112_v38 = vsel %vm111_vm3, %v336_v28, %v108_v34 }
 0x119   : > { %v117_v42 = vsel %vm114_vm4, %v116_v40, %v112_v38  ;;  %v149_v47 = vsel %vm148_vm7, %v338_v31, %v145_v44 }
 0x11a   : > { %v154_v50 = vsel %vm151_vm8, %v153_v48, %v149_v47  ;;  %v120_v52 = vmul.f32 %v425_v2, %v117_v42 }
 0x11b   : > { %v157_v54 = vmul.f32 %v417_v0, %v154_v50 }
 0x170   : > { %v123_v41 = vpop.permute.xlu1 %122 }
 0x171   : > { %v125_v43 = vmul.f32 %v123_v41, %v117_v42 }
 0x173   : > { %127 = vrot.lane.b32.xlu2 %v125_v43, %s435_s26 }
 0x178   : > { %v160_v49 = vpop.permute.xlu1 %159 }
 0x179   : > { %v162_v51 = vmul.f32 %v160_v49, %v154_v50 }
 0x17b   : > { %164 = vrot.lane.b32.xlu2 %v162_v51, %s435_s26 }
 0x1cd   : > { %v128_v53 = vpop.permute.xlu2 %127 }
 0x1ce   : > { %v130_v2 = vadd.f32 %v128_v53, %v120_v52  }
 0x1d0   : > { %339 = vtanh.f32 %v130_v2 }
 0x1d5   : > { %v165_v55 = vpop.permute.xlu2 %164 }
 0x1d6   : > { %v340_v56 = vpop.eup %339  ;;  %v167_v0 = vadd.f32 %v165_v55, %v157_v54  }
 0x1d7   : > { %133 = vrot.lane.b32.xlu0 %v340_v56, %s436_s25 }
 0x1d8   : > { %341 = vtanh.f32 %v167_v0 }
 0x1de   : > { %v342_v57 = vpop.eup %341 }
 0x1df   : > { %170 = vrot.lane.b32.xlu1 %v342_v57, %s436_s25 }
 0x249   : > { %v134_v58 = vpop.permute.xlu0 %133 }
 0x24a   : > { %v136_v59 = vmul.f32 %v134_v58, %v117_v42  }
 0x24c   : > { %175 = vrot.lane.b32.xlu2 %v136_v59, %s435_s26  ;;  %v584_v3 = vmov %v136_v59 }
 0x251   : > { %v171_v60 = vpop.permute.xlu1 %170 }
 0x252   : > { %v173_v61 = vmul.f32 %v171_v60, %v154_v50  }
 0x254   : > { %182 = vrot.lane.b32.xlu0 %v173_v61, %s435_s26  ;;  %v583_v1 = vmov %v173_v61  ;;  %s437_s26 = smov (%p22_p0), 32  }
 0x25c   :  { %189 = vrot.lane.b32.xlu0 (%p22_p0), %v136_v59, %s437_s26 }
 0x264   :  { %195 = vrot.lane.b32.xlu0 (%p22_p0), %v173_v61, %s437_s26 }
 0x2a6   : > { %v176_v62 = vpop.permute.xlu2 %175 }
 0x2a7   : > { %180 = vst.msk [vmem:[%s179_s28] sm:$0xff] %vm46_vm0, %v176_v62 }
 0x2a8   :  { %211 = dma.vmem_to_hbm [thread:$0]  (%p22_p0), %s204_s8, 1024, %s206_s11, [#allocation3], %s439_s12, %s439_s12, %s440_s13  }
 0x2c3   :  { %24 = sbr.rel (!%p22_p0) target bundleno = 3 (0x3), region = 67 }
 0x2c6   : > { %v183_v63 = vpop.permute.xlu0 %182 }
 0x2c7   : > { %187 = vst.msk [vmem:[%s186_s30] sm:$0xff] %vm46_vm0, %v183_v63 }
 0x2c8   :  { %224 = dma.vmem_to_hbm [thread:$0]  %s217_s21, 1024, %s219_s16, [#allocation5], %s439_s12, %s439_s12, %s440_s13  }
 0x2ce   :  { %v190_v0 = vpop.permute.xlu0 %189 }
 0x2cf   :  { %193 = vst.msk [vmem:[%s581_s5] sm:$0xff] %vm46_vm0, %v190_v0 }
 0x2d6   :  { %v196_v1 = vpop.permute.xlu0 %195 }
 0x2d7   :  { %198 = vst.msk [vmem:[%s582_s6] sm:$0xff] %vm46_vm0, %v196_v1 }
 0x2d8   :  { %411 = dma.done.wait [#allocation3], 1024  }
 0x2d9   :  { %412 = vsyncadd [#allocation3], 4294966272 }
 0x2da   :  { %413 = dma.done.wait [#allocation5], 1024  }
 0x2db   :  { %414 = vsyncadd [#allocation5], 4294966272 }
 0x2dc   :  { %241 = vsyncpa [#allocation3], 1 }
 0x2dd   :  { %242 = vsyncpa [#allocation5], 1 }

// kernel: bilstm_forward.6
= control target key start
LH: loop header
LB: loop body
LE: loop exit
PB: predicated region body
PF: predicated region fallthrough
CT: control target
= control target key end

     0   :  { %vm52_vm0 = vcmask 261120   ;;  %s568_s2 = inlined_call_operand.vmem [shape: f32[32,256], index: 2, kind: input, shape index: {}]   ;;  %s569_s3 = inlined_call_operand.vmem [shape: f32[32,256], index: 3, kind: input, shape index: {}]   ;;  %s570_s0 = inlined_call_operand.vmem [shape: f32[64,32], index: 0, kind: input, shape index: {}]   ;;  %s571_s1 = inlined_call_operand.vmem [shape: f32[64,32], index: 1, kind: input, shape index: {}]   ;;  %s572_s4 = inlined_call_operand.vmem [shape: f32[1,256], index: 4, kind: input, shape index: {}]   ;;  %s573_s5 = inlined_call_operand.vmem [shape: f32[64,256], index: 5, kind: output, shape index: {}]  }
   0x1   :  { %v34_v0 = vld [vmem:[%s568_s2 + $0x30] sm:$0xff]  ;;  %v35_v1 = vld [vmem:[%s568_s2 + $0x38] sm:$0xff]  ;;  %v32_v2 = vld [vmem:[%s568_s2 + $0x20] sm:$0xff] }
   0x2   :  { %195 = vmatpush.msra.mxu2 %v34_v0  ;;  %236 = vmatpush.msra.mxu3 %v35_v1  ;;  %v33_v3 = vld [vmem:[%s568_s2 + $0x28] sm:$0xff]  ;;  %v30_v4 = vld [vmem:[%s568_s2 + $0x10] sm:$0xff]  ;;  %v31_v5 = vld [vmem:[%s568_s2 + $0x18] sm:$0xff] }
   0x3   :  { %v50_v6 = vld [vmem:[%s569_s3 + $0x30] sm:$0xff]  ;;  %v51_v7 = vld [vmem:[%s569_s3 + $0x38] sm:$0xff]  ;;  %v48_v8 = vld [vmem:[%s569_s3 + $0x20] sm:$0xff] }
   0x4   :  { %196 = vmatpush.msra.mxu2 %v32_v2  ;;  %237 = vmatpush.msra.mxu3 %v33_v3  ;;  %v28_v9 = vld [vmem:[%s568_s2] sm:$0xff]  ;;  %v29_v10 = vld [vmem:[%s568_s2 + $0x8] sm:$0xff]  ;;  %v46_v13 = vld [vmem:[%s569_s3 + $0x10] sm:$0xff] }
   0x5   :  { %89 = vmatpush.msra.mxu0 %v50_v6  ;;  %130 = vmatpush.msra.mxu1 %v51_v7  ;;  %v49_v11 = vld [vmem:[%s569_s3 + $0x28] sm:$0xff]  ;;  %v20_v12 = vld [vmem:[%s570_s0] sm:$0xff]  ;;  %v47_v14 = vld [vmem:[%s569_s3 + $0x18] sm:$0xff] }
   0x6   :  { %197 = vmatpush.msra.mxu2 %v30_v4  ;;  %238 = vmatpush.msra.mxu3 %v31_v5  ;;  %v44_v15 = vld [vmem:[%s569_s3] sm:$0xff]  ;;  %v45_v16 = vld [vmem:[%s569_s3 + $0x8] sm:$0xff]  ;;  %v22_v20 = vld [vmem:[%s570_s0 + $0x10] sm:$0xff] }
   0x7   :  { %90 = vmatpush.msra.mxu0 %v48_v8  ;;  %131 = vmatpush.msra.mxu1 %v49_v11  ;;  %v36_v17 = vld [vmem:[%s571_s1] sm:$0xff]  ;;  %v21_v18 = vld [vmem:[%s570_s0 + $0x8] sm:$0xff]  ;;  %v38_v21 = vld [vmem:[%s571_s1 + $0x10] sm:$0xff] }
   0x8   :  { %198 = vmatpush.msra.mxu2 %v28_v9  ;;  %239 = vmatpush.msra.mxu3 %v29_v10  ;;  %v37_v19 = vld [vmem:[%s571_s1 + $0x8] sm:$0xff]  ;;  %v23_v22 = vld [vmem:[%s570_s0 + $0x18] sm:$0xff]  ;;  %v24_v24 = vld [vmem:[%s570_s0 + $0x20] sm:$0xff] }
   0x9   :  { %323 = vmatmul.msk.f32.vlgmr.msra.gmra.mxu2 %vm52_vm0, %v20_v12  ;;  %331 = vmatmul.msk.f32.vlgmr.msra.gmra.mxu3 %vm52_vm0, %v20_v12  ;;  %v39_v23 = vld [vmem:[%s571_s1 + $0x18] sm:$0xff]  ;;  %v40_v25 = vld [vmem:[%s571_s1 + $0x20] sm:$0xff]  ;;  %v25_v26 = vld [vmem:[%s570_s0 + $0x28] sm:$0xff] }
   0xa   :  { %91 = vmatpush.msra.mxu0 %v46_v13  ;;  %132 = vmatpush.msra.mxu1 %v47_v14  ;;  %v41_v27 = vld [vmem:[%s571_s1 + $0x28] sm:$0xff]  ;;  %v26_v28 = vld [vmem:[%s570_s0 + $0x30] sm:$0xff]  ;;  %v27_v30 = vld [vmem:[%s570_s0 + $0x38] sm:$0xff] }
   0xb   :  { %v42_v29 = vld [vmem:[%s571_s1 + $0x30] sm:$0xff]  ;;  %v43_v31 = vld [vmem:[%s571_s1 + $0x38] sm:$0xff]  ;;  %v265_v32 = vld [vmem:[%s572_s4] sm:$0x3] }
   0xc   :  { %92 = vmatpush.msra.mxu0 %v44_v15  ;;  %133 = vmatpush.msra.mxu1 %v45_v16  ;;  %v500_v35 = vperm.slane %v265_v32, 0  ;;  %v502_v36 = vperm.slane %v265_v32, 1 }
   0xd   :  { %307 = vmatmul.msk.f32.vlgmr.msra.gmra.mxu0 %vm52_vm0, %v36_v17  ;;  %315 = vmatmul.msk.f32.vlgmr.msra.gmra.mxu1 %vm52_vm0, %v36_v17 }
  0x11   :  { %324 = vmatmul.msk.f32.gmra.mxu2 %vm52_vm0, %v21_v18  ;;  %332 = vmatmul.msk.f32.gmra.mxu3 %vm52_vm0, %v21_v18 }
  0x15   :  { %308 = vmatmul.msk.f32.gmra.mxu0 %vm52_vm0, %v37_v19  ;;  %316 = vmatmul.msk.f32.gmra.mxu1 %vm52_vm0, %v37_v19 }
  0x19   :  { %325 = vmatmul.msk.f32.gmra.mxu2 %vm52_vm0, %v22_v20  ;;  %333 = vmatmul.msk.f32.gmra.mxu3 %vm52_vm0, %v22_v20 }
  0x1d   :  { %309 = vmatmul.msk.f32.gmra.mxu0 %vm52_vm0, %v38_v21  ;;  %317 = vmatmul.msk.f32.gmra.mxu1 %vm52_vm0, %v38_v21 }
  0x21   :  { %326 = vmatmul.msk.f32.gmra.mxu2 %vm52_vm0, %v23_v22  ;;  %334 = vmatmul.msk.f32.gmra.mxu3 %vm52_vm0, %v23_v22 }
  0x25   :  { %310 = vmatmul.msk.f32.gmra.mxu0 %vm52_vm0, %v39_v23  ;;  %318 = vmatmul.msk.f32.gmra.mxu1 %vm52_vm0, %v39_v23 }
  0x29   :  { %327 = vmatmul.msk.f32.gmra.mxu2 %vm52_vm0, %v24_v24  ;;  %335 = vmatmul.msk.f32.gmra.mxu3 %vm52_vm0, %v24_v24 }
  0x2d   :  { %311 = vmatmul.msk.f32.gmra.mxu0 %vm52_vm0, %v40_v25  ;;  %319 = vmatmul.msk.f32.gmra.mxu1 %vm52_vm0, %v40_v25 }
  0x31   :  { %328 = vmatmul.msk.f32.gmra.mxu2 %vm52_vm0, %v25_v26  ;;  %336 = vmatmul.msk.f32.gmra.mxu3 %vm52_vm0, %v25_v26 }
  0x35   :  { %312 = vmatmul.msk.f32.gmra.mxu0 %vm52_vm0, %v41_v27  ;;  %320 = vmatmul.msk.f32.gmra.mxu1 %vm52_vm0, %v41_v27 }
  0x39   :  { %329 = vmatmul.msk.f32.gmra.mxu2 %vm52_vm0, %v26_v28  ;;  %337 = vmatmul.msk.f32.gmra.mxu3 %vm52_vm0, %v26_v28 }
  0x3d   :  { %313 = vmatmul.msk.f32.gmra.mxu0 %vm52_vm0, %v42_v29  ;;  %321 = vmatmul.msk.f32.gmra.mxu1 %vm52_vm0, %v42_v29 }
  0x41   :  { %330 = vmatmul.msk.f32.gmra.mxu2 %vm52_vm0, %v27_v30  ;;  %338 = vmatmul.msk.f32.gmra.mxu3 %vm52_vm0, %v27_v30 }
  0x45   :  { %314 = vmatmul.msk.f32.gmra.mxu0 %vm52_vm0, %v43_v31  ;;  %322 = vmatmul.msk.f32.gmra.mxu1 %vm52_vm0, %v43_v31 }
  0x8a   :  { %v94_v33 = vpop.f32.mrf.mxu0  ;;  %v135_v34 = vpop.f32.mrf.mxu1 }
  0x8c   :  { %v200_v37 = vpop.f32.mrf.mxu2  ;;  %v241_v38 = vpop.f32.mrf.mxu3 }
  0x8d   :  { %v201_v39 = vadd.f32 %v200_v37, %v94_v33  ;;  %v242_v40 = vadd.f32 %v241_v38, %v135_v34 }
  0x8f   :  { %v271_v41 = vadd.f32 %v500_v35, %v201_v39  ;;  %v272_v42 = vadd.f32 %v502_v36, %v242_v40 }
  0x91   :  { %287 = vst [vmem:[%s573_s5] sm:$0xff] %v271_v41 }
  0x92   :  { %288 = vst [vmem:[%s573_s5 + $0x8] sm:$0xff] %v272_v42  ;;  %v97_v43 = vpop.f32.mrf.mxu0  ;;  %v138_v44 = vpop.f32.mrf.mxu1 }
  0x94   :  { %v203_v45 = vpop.f32.mrf.mxu2  ;;  %v244_v46 = vpop.f32.mrf.mxu3 }
  0x95   :  { %v204_v47 = vadd.f32 %v203_v45, %v97_v43  ;;  %v245_v48 = vadd.f32 %v244_v46, %v138_v44 }
  0x97   :  { %v273_v49 = vadd.f32 %v500_v35, %v204_v47  ;;  %v274_v50 = vadd.f32 %v502_v36, %v245_v48 }
  0x99   :  { %289 = vst [vmem:[%s573_s5 + $0x10] sm:$0xff] %v273_v49 }
  0x9a   :  { %290 = vst [vmem:[%s573_s5 + $0x18] sm:$0xff] %v274_v50  ;;  %v100_v51 = vpop.f32.mrf.mxu0  ;;  %v141_v52 = vpop.f32.mrf.mxu1 }
  0x9c   :  { %v206_v53 = vpop.f32.mrf.mxu2  ;;  %v247_v54 = vpop.f32.mrf.mxu3 }
  0x9d   :  { %v207_v55 = vadd.f32 %v206_v53, %v100_v51  ;;  %v248_v56 = vadd.f32 %v247_v54, %v141_v52 }
  0x9f   :  { %v275_v57 = vadd.f32 %v500_v35, %v207_v55  ;;  %v276_v58 = vadd.f32 %v502_v36, %v248_v56 }
  0xa1   :  { %291 = vst [vmem:[%s573_s5 + $0x20] sm:$0xff] %v275_v57 }
  0xa2   :  { %292 = vst [vmem:[%s573_s5 + $0x28] sm:$0xff] %v276_v58  ;;  %v103_v59 = vpop.f32.mrf.mxu0  ;;  %v144_v60 = vpop.f32.mrf.mxu1 }
  0xa4   :  { %v209_v61 = vpop.f32.mrf.mxu2  ;;  %v250_v62 = vpop.f32.mrf.mxu3 }
  0xa5   :  { %v210_v63 = vadd.f32 %v209_v61, %v103_v59  ;;  %v251_v0 = vadd.f32 %v250_v62, %v144_v60 }
  0xa7   :  { %v277_v1 = vadd.f32 %v500_v35, %v210_v63  ;;  %v278_v2 = vadd.f32 %v502_v36, %v251_v0 }
  0xa9   :  { %293 = vst [vmem:[%s573_s5 + $0x30] sm:$0xff] %v277_v1 }
  0xaa   :  { %294 = vst [vmem:[%s573_s5 + $0x38] sm:$0xff] %v278_v2  ;;  %v106_v3 = vpop.f32.mrf.mxu0  ;;  %v147_v4 = vpop.f32.mrf.mxu1 }
  0xac   :  { %v212_v5 = vpop.f32.mrf.mxu2  ;;  %v253_v6 = vpop.f32.mrf.mxu3 }
  0xad   :  { %v213_v7 = vadd.f32 %v212_v5, %v106_v3  ;;  %v254_v8 = vadd.f32 %v253_v6, %v147_v4 }
  0xaf   :  { %v279_v9 = vadd.f32 %v500_v35, %v213_v7  ;;  %v280_v10 = vadd.f32 %v502_v36, %v254_v8 }
  0xb1   :  { %295 = vst [vmem:[%s573_s5 + $0x40] sm:$0xff] %v279_v9 }
  0xb2   :  { %296 = vst [vmem:[%s573_s5 + $0x48] sm:$0xff] %v280_v10  ;;  %v109_v11 = vpop.f32.mrf.mxu0  ;;  %v150_v12 = vpop.f32.mrf.mxu1 }
  0xb4   :  { %v215_v13 = vpop.f32.mrf.mxu2  ;;  %v256_v14 = vpop.f32.mrf.mxu3 }
  0xb5   :  { %v216_v15 = vadd.f32 %v215_v13, %v109_v11  ;;  %v257_v16 = vadd.f32 %v256_v14, %v150_v12 }
  0xb7   :  { %v281_v17 = vadd.f32 %v500_v35, %v216_v15  ;;  %v282_v18 = vadd.f32 %v502_v36, %v257_v16 }
  0xb9   :  { %297 = vst [vmem:[%s573_s5 + $0x50] sm:$0xff] %v281_v17 }
  0xba   :  { %298 = vst [vmem:[%s573_s5 + $0x58] sm:$0xff] %v282_v18  ;;  %v112_v19 = vpop.f32.mrf.mxu0  ;;  %v153_v20 = vpop.f32.mrf.mxu1 }
  0xbc   :  { %v218_v21 = vpop.f32.mrf.mxu2  ;;  %v259_v22 = vpop.f32.mrf.mxu3 }
  0xbd   :  { %v219_v23 = vadd.f32 %v218_v21, %v112_v19  ;;  %v260_v24 = vadd.f32 %v259_v22, %v153_v20 }
  0xbf   :  { %v283_v25 = vadd.f32 %v500_v35, %v219_v23  ;;  %v284_v26 = vadd.f32 %v502_v36, %v260_v24 }
  0xc1   :  { %299 = vst [vmem:[%s573_s5 + $0x60] sm:$0xff] %v283_v25 }
  0xc2   :  { %300 = vst [vmem:[%s573_s5 + $0x68] sm:$0xff] %v284_v26  ;;  %v115_v27 = vpop.f32.mrf.mxu0  ;;  %v156_v28 = vpop.f32.mrf.mxu1 }
  0xc4   :  { %v221_v29 = vpop.f32.mrf.mxu2  ;;  %v262_v30 = vpop.f32.mrf.mxu3 }
  0xc5   :  { %v222_v31 = vadd.f32 %v221_v29, %v115_v27  ;;  %v263_v32 = vadd.f32 %v262_v30, %v156_v28 }
  0xc7   :  { %v285_v33 = vadd.f32 %v500_v35, %v222_v31  ;;  %v286_v34 = vadd.f32 %v502_v36, %v263_v32 }
  0xc9   :  { %301 = vst [vmem:[%s573_s5 + $0x70] sm:$0xff] %v285_v33 }
  0xca   :  { %302 = vst [vmem:[%s573_s5 + $0x78] sm:$0xff] %v286_v34 }

// kernel: bilstm_forward.5
= control target key start
LH: loop header
LB: loop body
LE: loop exit
PB: predicated region body
PF: predicated region fallthrough
CT: control target
= control target key end

     0   :  { %12 = vsyncpa [#allocation3], 0  ;;  %s568_s0 = inlined_call_operand.vmem [shape: f32[8,8,256], index: 0, kind: input, shape index: {}]   ;;  %s569_s1 = inlined_call_operand.vmem [shape: f32[32,128], index: 1, kind: input, shape index: {}]   ;;  %s570_s2 = inlined_call_operand.vmem [shape: f32[32,128], index: 2, kind: input, shape index: {}]   ;;  %s571_s3 = inlined_call_operand.vmem [shape: f32[8,8,32], index: 3, kind: output, shape index: {0}]   ;;  %s572_s4 = inlined_call_operand.vmem [shape: f32[8,8,32], index: 4, kind: output, shape index: {1}]   ;;  %s573_s5 = inlined_call_operand.hbm [shape: f32[8,32], index: 5, kind: output, shape index: {2}]   ;;  %s574_s6 = inlined_call_operand.hbm [shape: f32[8,32], index: 6, kind: output, shape index: {3}]  }
   0x1   :  { %13 = vsyncpa [#allocation5], 0  ;;  %v469_v0 = vmov 0.0   ;;  %v471_v1 = vmov 0.0   ;;  %v473_v2 = vmov 0.0   ;;  %v475_v3 = vmov 0.0  }
   0x2   :  { %s477_s21 = smov 0  }
   0x3 LB: > { %v42_v4 = vld [vmem:[%s569_s1 + $0x18] sm:$0xff]  ;;  %v41_v5 = vld [vmem:[%s569_s1 + $0x10] sm:$0xff]  ;;  %s429_s26 = smov 32   ;;  %v40_v6 = vld [vmem:[%s569_s1 + $0x8] sm:$0xff]  ;;  %vm46_vm0 = vcmask 261120   ;;  %s274_s15 = sshll.u32 %s427_s21, 4  ;;  %s427_s21 = sphi %s477_s21, %s25_s21   ;;  %v423_v3 = vphi %v475_v3, %v576_v3   ;;  %v419_v2 = vphi %v473_v2, %v130_v2   ;;  %v415_v1 = vphi %v471_v1, %v575_v1   ;;  %v411_v0 = vphi %v469_v0, %v167_v0  }
   0x4   : > { %61 = vmatpush.msra.mxu0 %v42_v4  ;;  %44 = vrot.lane.b32.xlu0 %v423_v3, %s429_s26  ;;  %v39_v7 = vld [vmem:[%s569_s1] sm:$0xff]  ;;  %v73_v8 = vld [vmem:[%s570_s2 + $0x18] sm:$0xff]  ;;  %v72_v9 = vld [vmem:[%s570_s2 + $0x10] sm:$0xff]  ;;  %s33_s18 = scalar_lea.vmem %s568_s0, %s274_s15  ;;  %s30_s19 = ssub.s32 7, %s427_s21 }
   0x5   : > { %91 = vmatpush.msra.mxu1 %v73_v8  ;;  %v71_v10 = vld [vmem:[%s570_s2 + $0x8] sm:$0xff]  ;;  %v70_v11 = vld [vmem:[%s570_s2] sm:$0xff]  ;;  %s275_s20 = sshll.u32 %s30_s19, 4  ;;  %s430_s25 = smov 64  }
   0x6   : > { %62 = vmatpush.msra.mxu0 %v41_v5  ;;  %v34_v14 = vld [vmem:[%s33_s18] sm:$0xff]  ;;  %s37_s24 = scalar_lea.vmem %s568_s0, %s275_s20  ;;  %s272_s27 = sshll.u32 %s427_s21, 3 }
   0x7   : > { %92 = vmatpush.msra.mxu1 %v72_v9  ;;  %v38_v17 = vld [vmem:[%s37_s24 + $0x8] sm:$0xff]  ;;  %s179_s30 = scalar_lea.vmem %s571_s3, %s272_s27  ;;  %s273_s7 = sshll.u32 %s30_s19, 3 }
   0x8   : > { %63 = vmatpush.msra.mxu0 %v40_v6  ;;  %s186_s10 = scalar_lea.vmem %s572_s4, %s273_s7  ;;  %s25_s21 = sadd.s32 1, %s427_s21  }
   0x9   : > { %93 = vmatpush.msra.mxu1 %v71_v10  ;;  %p22_p0 = scmp.ge.s32.totalorder %s25_s21, 8  }
   0xa   : > { %64 = vmatpush.msra.mxu0 %v39_v7  ;;  %s432_s11 = smov (%p22_p0), [#allocation2]   ;;  %s210_s15 = sshll.u32 (%p22_p0), %s573_s5, 4  ;;  %s211_s15 = int_to_ptr.hbm [resolvable:$true] %s210_s15 }
   0xb   : > { %94 = vmatpush.msra.mxu1 %v70_v11  ;;  %s208_s12 = sshll.u32 (%p22_p0), %s432_s11, 4  ;;  %s433_s16 = smov (%p22_p0), [#allocation4]   ;;  %s209_s12 = int_to_ptr.vmem [resolvable:$true] %s208_s12 }
   0xc   : > { %75 = vrot.lane.b32.xlu0 %v415_v1, %s429_s26  ;;  %s219_s17 = sshll.u32 (%p22_p0), %s433_s16, 4  ;;  %s221_s0 = sshll.u32 (%p22_p0), %s574_s6, 4  ;;  %s220_s17 = int_to_ptr.vmem [resolvable:$true] %s219_s17  ;;  %s222_s0 = int_to_ptr.hbm [resolvable:$true] %s221_s0 }
  0x76   : > { %v45_v12 = vpop.permute.xlu0 %44 }
  0x77   : > { %268 = vmatmul.msk.f32.vlgmr.msra.gmra.mxu0 %vm46_vm0, %v45_v12 }
  0x7e   : > { %v76_v13 = vpop.permute.xlu0 %75 }
  0x7f   : > { %269 = vmatmul.msk.f32.vlgmr.msra.gmra.mxu1 %vm46_vm0, %v76_v13 }
  0xf4   : > { %v66_v15 = vpop.f32.mrf.mxu0 }
  0xf5   : > { %v69_v16 = vadd.f32 %v66_v15, %v34_v14 }
  0xf7   : > { %321 = vtanh.f32 %v69_v16  ;;  %v270_v22 = vmul.f32 -1.442695, %v69_v16 }
  0xfc   : > { %v96_v18 = vpop.f32.mrf.mxu1 }
  0xfd   : > { %v322_v19 = vpop.eup %321  ;;  %v99_v20 = vadd.f32 %v96_v18, %v38_v17 }
  0xfe   : > { %122 = vrot.lane.b32.xlu1 %v322_v19, %s430_s25 }
  0xff   : > { %323 = vtanh.f32 %v99_v20  ;;  %v271_v23 = vmul.f32 -1.442695, %v99_v20 }
 0x100   : > { %325 = vpow2.f32 %v270_v22 }
 0x101   : > { %327 = vpow2.f32 %v271_v23 }
 0x105   : > { %v324_v21 = vpop.eup %323 }
 0x106   : > { %159 = vrot.lane.b32.xlu1 %v324_v21, %s430_s25  ;;  %v326_v24 = vpop.eup %325 }
 0x107   : > { %v103_v25 = vadd.f32 1.0, %v326_v24  ;;  %v328_v26 = vpop.eup %327 }
 0x108   : > { %v140_v27 = vadd.f32 1.0, %v328_v26 }
 0x109   : > { %329 = vrcp.f32 %v103_v25  ;;  %v115_v36 = vand.u32 2147483648, %v103_v25  ;;  %vm109_vm2 = vweird.f32 %v103_v25  ;;  %v113_v37 = vand.u32 2147483647, %v103_v25 }
 0x10a   : > { %331 = vrcp.f32 %v140_v27  ;;  %v152_v45 = vand.u32 2147483648, %v140_v27  ;;  %vm146_vm6 = vweird.f32 %v140_v27  ;;  %v150_v46 = vand.u32 2147483647, %v140_v27 }
 0x10b   : > { %v116_v40 = vor.u32 1.1754944e-38, %v115_v36  ;;  %vm114_vm4 = vcmp.eq.f32.partialorder %v113_v37, 8.507059e+37 }
 0x10c   : > { %v153_v48 = vor.u32 1.1754944e-38, %v152_v45  ;;  %vm151_vm8 = vcmp.eq.f32.partialorder %v150_v46, 8.507059e+37 }
 0x10f   : > { %v330_v28 = vpop.eup %329 }
 0x110   : > { %v105_v29 = vmul.f32 %v330_v28, %v103_v25  ;;  %v332_v31 = vpop.eup %331  ;;  %vm110_vm1 = vweird.f32 %v330_v28 }
 0x111   : > { %v142_v33 = vmul.f32 %v332_v31, %v140_v27  ;;  %vm111_vm3 = vmor %vm109_vm2, %vm110_vm1  ;;  %vm147_vm5 = vweird.f32 %v332_v31 }
 0x112   : > { %v106_v30 = vsub.f32 1.0, %v105_v29  ;;  %vm148_vm7 = vmor %vm146_vm6, %vm147_vm5 }
 0x113   : > { %v143_v35 = vsub.f32 1.0, %v142_v33 }
 0x114   : > { %v107_v32 = vmul.f32 %v330_v28, %v106_v30 }
 0x115   : > { %v144_v39 = vmul.f32 %v332_v31, %v143_v35 }
 0x116   : > { %v108_v34 = vadd.f32 %v330_v28, %v107_v32 }
 0x117   : > { %v145_v44 = vadd.f32 %v332_v31, %v144_v39 }
 0x118   : > { %v112_v38 = vsel %vm111_vm3, %v330_v28, %v108_v34 }
 0x119   : > { %v117_v42 = vsel %vm114_vm4, %v116_v40, %v112_v38  ;;  %v149_v47 = vsel %vm148_vm7, %v332_v31, %v145_v44 }
 0x11a   : > { %v154_v50 = vsel %vm151_vm8, %v153_v48, %v149_v47  ;;  %v120_v52 = vmul.f32 %v419_v2, %v117_v42 }
 0x11b   : > { %v157_v54 = vmul.f32 %v411_v0, %v154_v50 }
 0x170   : > { %v123_v41 = vpop.permute.xlu1 %122 }
 0x171   : > { %v125_v43 = vmul.f32 %v123_v41, %v117_v42 }
 0x173   : > { %127 = vrot.lane.b32.xlu2 %v125_v43, %s429_s26 }
 0x178   : > { %v160_v49 = vpop.permute.xlu1 %159 }
 0x179   : > { %v162_v51 = vmul.f32 %v160_v49, %v154_v50 }
 0x17b   : > { %164 = vrot.lane.b32.xlu2 %v162_v51, %s429_s26 }
 0x1cd   : > { %v128_v53 = vpop.permute.xlu2 %127 }
 0x1ce   : > { %v130_v2 = vadd.f32 %v128_v53, %v120_v52  }
 0x1d0   : > { %333 = vtanh.f32 %v130_v2 }
 0x1d5   : > { %v165_v55 = vpop.permute.xlu2 %164 }
 0x1d6   : > { %v334_v56 = vpop.eup %333  ;;  %v167_v0 = vadd.f32 %v165_v55, %v157_v54  }
 0x1d7   : > { %133 = vrot.lane.b32.xlu0 %v334_v56, %s430_s25 }
 0x1d8   : > { %335 = vtanh.f32 %v167_v0 }
 0x1de   : > { %v336_v57 = vpop.eup %335 }
 0x1df   : > { %170 = vrot.lane.b32.xlu1 %v336_v57, %s430_s25 }
 0x249   : > { %v134_v58 = vpop.permute.xlu0 %133 }
 0x24a   : > { %v136_v59 = vmul.f32 %v134_v58, %v117_v42  }
 0x24c   : > { %175 = vrot.lane.b32.xlu2 %v136_v59, %s429_s26  ;;  %v576_v3 = vmov %v136_v59 }
 0x251   : > { %v171_v60 = vpop.permute.xlu1 %170 }
 0x252   : > { %v173_v61 = vmul.f32 %v171_v60, %v154_v50  }
 0x254   : > { %182 = vrot.lane.b32.xlu0 %v173_v61, %s429_s26  ;;  %v575_v1 = vmov %v173_v61  ;;  %s431_s26 = smov (%p22_p0), 32  }
 0x25c   :  { %189 = vrot.lane.b32.xlu0 (%p22_p0), %v136_v59, %s431_s26 }
 0x264   :  { %195 = vrot.lane.b32.xlu0 (%p22_p0), %v173_v61, %s431_s26 }
 0x2a6   : > { %v176_v62 = vpop.permute.xlu2 %175 }
 0x2a7   : > { %180 = vst.msk [vmem:[%s179_s30] sm:$0xff] %vm46_vm0, %v176_v62 }
 0x2c3   :  { %24 = sbr.rel (!%p22_p0) target bundleno = 3 (0x3), region = 67 }
 0x2c6   : > { %v183_v63 = vpop.permute.xlu0 %182 }
 0x2c7   : > { %187 = vst.msk [vmem:[%s186_s10] sm:$0xff] %vm46_vm0, %v183_v63 }
 0x2ce   :  { %v190_v3 = vpop.permute.xlu0 %189 }
 0x2cf   :  { %193 = vst.msk [vmem:[#allocation2] sm:$0xff] %vm46_vm0, %v190_v3 }
 0x2d0   :  { %213 = dma.vmem_to_hbm [thread:$0]  %s209_s12, 128, %s211_s15, [#allocation3]  }
 0x2d6   :  { %v196_v0 = vpop.permute.xlu0 %195 }
 0x2d7   :  { %198 = vst.msk [vmem:[#allocation4] sm:$0xff] %vm46_vm0, %v196_v0 }
 0x2d8   :  { %224 = dma.vmem_to_hbm [thread:$0]  %s220_s17, 128, %s222_s0, [#allocation5]  }
 0x2d9   :  { %405 = dma.done.wait [#allocation3], 128  }
 0x2da   :  { %406 = vsyncadd [#allocation3], 4294967168 }
 0x2db   :  { %407 = dma.done.wait [#allocation5], 128  }
 0x2dc   :  { %408 = vsyncadd [#allocation5], 4294967168 }
 0x2dd   :  { %237 = vsyncpa [#allocation3], 1 }
 0x2de   :  { %238 = vsyncpa [#allocation5], 1 }

</bundles_post_ra>
